<compile_context>
chip_gen: v5e
topology: v5e:2x2
jax: 0.10.0
libtpu: 0.0.40
codegen_flags: <defaults>
</compile_context>

<pallas_src>
import functools

import jax
import jax.numpy as jnp
from jax import lax
from jax.experimental import pallas as pl
from jax.experimental.pallas import tpu as pltpu


# ----------------------------------------------------------------------------
# Pallas kernel
# ----------------------------------------------------------------------------
def _ln2d_kernel(x_ref, w_ref, b_ref, o_ref, *, eps):
    # x_ref block: (1, C, tw)  -- channels on sublanes, pixels on lanes.
    x = x_ref[0].astype(jnp.float32)                    # (C, tw)
    mu = jnp.mean(x, axis=0, keepdims=True)             # (1, tw)
    xc = x - mu
    var = jnp.mean(xc * xc, axis=0, keepdims=True)      # (1, tw)
    inv = lax.rsqrt(var + eps)                          # EUP rsqrt (free-ish slot)
    y = xc * inv * w_ref[...] + b_ref[...]              # (C,1) broadcast over lanes
    o_ref[0] = y.astype(o_ref.dtype)


# ----------------------------------------------------------------------------
# pallas_call wrapper
# ----------------------------------------------------------------------------
def _pick_lane_tile(hw, c, max_block_bytes):
    """Largest legal lane tile: full extent if it fits, else a 128-multiple."""
    cap = max(128, ((max_block_bytes // (4 * max(c, 1))) // 128) * 128)
    if hw <= cap:
        return hw          # full spatial extent: always a legal last block dim
    return cap             # multiple of 128; ragged tail -> partial last block


def layernorm2d(x, weight, bias, *, eps=1e-6, max_block_bytes=4 << 20,
                lane_tile=None):
    """LayerNorm2d forward: per-pixel channel normalization of NCHW input."""
    B, C, H, W = x.shape
    HW = H * W
    tw = lane_tile if lane_tile is not None else _pick_lane_tile(
        HW, C, max_block_bytes)

    x3 = x.reshape(B, C, HW)                       # pure reshape, no HBM transpose
    w2 = weight.reshape(C, 1).astype(jnp.float32)
    b2 = bias.reshape(C, 1).astype(jnp.float32)

    grid = (B, pl.cdiv(HW, tw))
    out = pl.pallas_call(
        functools.partial(_ln2d_kernel, eps=float(eps)),
        out_shape=jax.ShapeDtypeStruct((B, C, HW), x.dtype),
        grid=grid,
        in_specs=[
            pl.BlockSpec((1, C, tw), lambda b, j: (b, 0, j)),
            pl.BlockSpec((C, 1), lambda b, j: (0, 0)),
            pl.BlockSpec((C, 1), lambda b, j: (0, 0)),
        ],
        out_specs=pl.BlockSpec((1, C, tw), lambda b, j: (b, 0, j)),
        compiler_params=pltpu.CompilerParams(
            dimension_semantics=("parallel", "parallel"),
            vmem_limit_bytes=32 * 1024 * 1024,
        ),
    )(x3, w2, b2)
    return out.reshape(B, C, H, W)


# ----------------------------------------------------------------------------
# pure-JAX reference (matches the PyTorch autograd.Function forward)
# ----------------------------------------------------------------------------
def layernorm2d_ref(x, weight, bias, eps=1e-6):
    mu = jnp.mean(x, axis=1, keepdims=True)
    var = jnp.mean((x - mu) ** 2, axis=1, keepdims=True)
    y = (x - mu) / jnp.sqrt(var + eps)
    C = x.shape[1]
    return weight.reshape(1, C, 1, 1) * y + bias.reshape(1, C, 1, 1)


if __name__ == "__main__":
    key = jax.random.PRNGKey(0)

    def run_case(shape, lane_tile=None):
        B, C, H, W = shape
        kx, kw, kb = jax.random.split(jax.random.fold_in(key, H * W + C), 3)
        x = jax.random.normal(kx, shape, dtype=jnp.float32)
        w = 1.0 + 0.1 * jax.random.normal(kw, (C,), dtype=jnp.float32)
        b = 0.1 * jax.random.normal(kb, (C,), dtype=jnp.float32)

        f = jax.jit(lambda x_, w_, b_: layernorm2d(x_, w_, b_,
                                                   lane_tile=lane_tile))
        out = jax.block_until_ready(f(x, w, b))
        ref = layernorm2d_ref(x, w, b)
        assert out.shape == shape
        assert bool(jnp.all(jnp.isfinite(out)))
        assert bool(jnp.allclose(out, ref, rtol=1e-4, atol=1e-4)), shape
        return out

    # main case: small shapes consistent with the module
    run_case((2, 16, 16, 16))
    # ragged spatial extent (H*W not a multiple of 128) -> full-extent block path
    run_case((2, 4, 10, 13))
    # forced multi-tile grid (exercises the tiled / partial-block path)
    run_case((1, 32, 16, 16), lane_tile=128)

    print("KERNEL_OK")
</pallas_src>

<mosaic_0001>
module attributes {stable_mosaic.version = 11 : i64} {
  func.func @_ln2d_kernel(%arg0: i32, %arg1: i32, %arg2: memref<1x16x256xf32, #tpu.memory_space<vmem>>, %arg3: memref<16x1xf32, #tpu.memory_space<vmem>>, %arg4: memref<16x1xf32, #tpu.memory_space<vmem>>, %arg5: memref<1x16x256xf32, #tpu.memory_space<vmem>>) attributes {dimension_semantics = [#tpu.dimension_semantics<parallel>, #tpu.dimension_semantics<parallel>], iteration_bounds = array<i64: 2, 1>, scalar_prefetch = 0 : i64, scratch_operands = 0 : i64, tpu.core_type = #tpu.core_type<tc>, window_params = [{transform_indices = @transform_0, window_bounds = array<i64: 1, 16, 256>}, {pipeline_mode = #tpu.pipeline_mode<synchronous>, transform_indices = @transform_1, window_bounds = array<i64: 16, 1>}, {pipeline_mode = #tpu.pipeline_mode<synchronous>, transform_indices = @transform_2, window_bounds = array<i64: 16, 1>}, {transform_indices = @transform_3, window_bounds = array<i64: 1, 16, 256>}]} {
    %c0 = arith.constant 0 : index
    %c0_0 = arith.constant 0 : index
    %c0_1 = arith.constant 0 : index
    %0 = vector.load %arg2[%c0, %c0_0, %c0_1] : memref<1x16x256xf32, #tpu.memory_space<vmem>>, vector<1x16x256xf32>
    %1 = vector.shape_cast %0 : vector<1x16x256xf32> to vector<16x256xf32>
    %cst = arith.constant dense<0.000000e+00> : vector<256xf32>
    %2 = vector.multi_reduction <add>, %1, %cst [0] : vector<16x256xf32> to vector<256xf32>
    %3 = vector.shape_cast %2 : vector<256xf32> to vector<1x256xf32>
    %cst_2 = arith.constant 1.600000e+01 : f32
    %4 = vector.broadcast %cst_2 : f32 to vector<1x256xf32>
    %5 = arith.divf %3, %4 : vector<1x256xf32>
    %6 = vector.broadcast %5 : vector<1x256xf32> to vector<16x256xf32>
    %7 = arith.subf %1, %6 : vector<16x256xf32>
    %8 = arith.mulf %7, %7 : vector<16x256xf32>
    %cst_3 = arith.constant dense<0.000000e+00> : vector<256xf32>
    %9 = vector.multi_reduction <add>, %8, %cst_3 [0] : vector<16x256xf32> to vector<256xf32>
    %10 = vector.shape_cast %9 : vector<256xf32> to vector<1x256xf32>
    %cst_4 = arith.constant 1.600000e+01 : f32
    %11 = vector.broadcast %cst_4 : f32 to vector<1x256xf32>
    %12 = arith.divf %10, %11 : vector<1x256xf32>
    %cst_5 = arith.constant 9.99999997E-7 : f32
    %13 = vector.broadcast %cst_5 : f32 to vector<1x256xf32>
    %14 = arith.addf %12, %13 : vector<1x256xf32>
    %15 = math.rsqrt %14 : vector<1x256xf32>
    %16 = vector.broadcast %15 : vector<1x256xf32> to vector<16x256xf32>
    %17 = arith.mulf %7, %16 : vector<16x256xf32>
    %c0_6 = arith.constant 0 : index
    %c0_7 = arith.constant 0 : index
    %18 = vector.load %arg3[%c0_6, %c0_7] : memref<16x1xf32, #tpu.memory_space<vmem>>, vector<16x1xf32>
    %19 = vector.broadcast %18 : vector<16x1xf32> to vector<16x256xf32>
    %20 = arith.mulf %17, %19 : vector<16x256xf32>
    %c0_8 = arith.constant 0 : index
    %c0_9 = arith.constant 0 : index
    %21 = vector.load %arg4[%c0_8, %c0_9] : memref<16x1xf32, #tpu.memory_space<vmem>>, vector<16x1xf32>
    %22 = vector.broadcast %21 : vector<16x1xf32> to vector<16x256xf32>
    %23 = arith.addf %20, %22 : vector<16x256xf32>
    %c0_10 = arith.constant 0 : index
    %c0_11 = arith.constant 0 : index
    %c0_12 = arith.constant 0 : index
    %24 = vector.load %arg5[%c0_10, %c0_11, %c0_12] : memref<1x16x256xf32, #tpu.memory_space<vmem>>, vector<1x16x256xf32>
    %25 = vector.shape_cast %24 : vector<1x16x256xf32> to vector<16x256xf32>
    %26 = vector.shape_cast %23 : vector<16x256xf32> to vector<1x16x256xf32>
    tpu.vector_store %arg5[%c0_10, %c0_11, %c0_12], %26 {strides = array<i32>} : memref<1x16x256xf32, #tpu.memory_space<vmem>>, vector<1x16x256xf32>,
    return
  }
  func.func @transform_0(%arg0: i32, %arg1: i32) -> (i32, i32, i32) {
    %c0_i32 = arith.constant 0 : i32
    %c0_i32_0 = arith.constant 0 : i32
    return %arg0, %c0_i32, %arg1 : i32, i32, i32
  }
  func.func @transform_1(%arg0: i32, %arg1: i32) -> (i32, i32) {
    %c0_i32 = arith.constant 0 : i32
    %c0_i32_0 = arith.constant 0 : i32
    %c0_i32_1 = arith.constant 0 : i32
    return %c0_i32, %c0_i32_0 : i32, i32
  }
  func.func @transform_2(%arg0: i32, %arg1: i32) -> (i32, i32) {
    %c0_i32 = arith.constant 0 : i32
    %c0_i32_0 = arith.constant 0 : i32
    %c0_i32_1 = arith.constant 0 : i32
    return %c0_i32, %c0_i32_0 : i32, i32
  }
  func.func @transform_3(%arg0: i32, %arg1: i32) -> (i32, i32, i32) {
    %c0_i32 = arith.constant 0 : i32
    %c0_i32_0 = arith.constant 0 : i32
    return %arg0, %c0_i32, %arg1 : i32, i32, i32
  }
}

</mosaic_0001>

<bundles_post_ra>
// kernel: _lambda_.1
= control target key start
LH: loop header
LB: loop body
LE: loop exit
PB: predicated region body
PF: predicated region fallthrough
CT: control target
= control target key end

     0   :  { %s503_s12 = smov 0   ;;  %s505_s13 = smov 0   ;;  %s555_s0 = inlined_call_operand.vmem [shape: f32[2,16,256], index: 0, kind: input, shape index: {}]   ;;  %s556_s1 = inlined_call_operand.vmem [shape: f32[16,1], index: 1, kind: input, shape index: {}]   ;;  %s557_s2 = inlined_call_operand.vmem [shape: f32[16,1], index: 2, kind: input, shape index: {}]   ;;  %s558_s3 = inlined_call_operand.vmem [shape: f32[2,16,256], index: 3, kind: output, shape index: {}]  }
   0x1   :  { %s507_s14 = smov 0  }
   0x2 LB: > { %s25_s15 = sadd.s32 1, %s475_s13  ;;  %p414_p0 = scmp.ge.s32.totalorder %s479_s14, 1  ;;  %s479_s14 = sphi %s507_s14, %s13_s14   ;;  %s475_s13 = sphi %s505_s13, %s560_s13   ;;  %s471_s12 = sphi %s503_s12, %s559_s12  }
   0x3   : > { %p27_p1 = scmp.ge.s32.totalorder %s25_s15, 2  ;;  %p158_p2 = scmp.lt.s32.totalorder %s479_s14, 3 }
   0x5   : > { %s562_s15 = smov (%p27_p1, %s25_s15), 0  ;;  %p159_p3 = pnand %p414_p0, %p158_p2 }
   0x6   : > { %p191_p4 = scmp.lt.s32.totalorder (!%p159_p3), %s471_s12, 1 }
   0x7   : > { %162 = sbr.rel (%p159_p3) target bundleno = 143 (0x8f), region = 32 }
   0xc   : > { %v303_v0 = vld [vmem:[%s557_s2] sm:$0xff]  ;;  %v481_v2 = vmov 0   ;;  %v304_v3 = vld [vmem:[%s557_s2 + $0x8] sm:$0xff]  ;;  %s564_s12 = smov (!%p191_p4, %s471_s12), 1  ;;  %v482_v5 = vmov 16.0  }
   0xd   : > { %v287_v1 = vld [vmem:[%s556_s1] sm:$0xff]  ;;  %450 = vset.pattern.permute.xlu1 %v481_v2  ;;  %449 = vset.pattern.permute.xlu0 %v481_v2  ;;  %v288_v4 = vld [vmem:[%s556_s1 + $0x8] sm:$0xff]  ;;  %s421_s24 = sshll.u32 %s564_s12, 5  ;;  %451 = vrcp.f32 %v482_v5 }
   0xe   : > { %307 = vperm.xlu1 %450, %v303_v0   ;;  %291 = vperm.xlu0 %449, %v287_v1   ;;  %s198_s27 = scalar_lea.vmem %s555_s0, %s421_s24  ;;  %s208_s30 = scalar_lea.vmem %s558_s3, %s421_s24 }
   0xf   : > { %v210_v6 = vld [vmem:[%s198_s27] sm:$0xff]  ;;  %v211_v7 = vld [vmem:[%s198_s27 + $0x8] sm:$0xff]  ;;  %v212_v8 = vld [vmem:[%s198_s27 + $0x10] sm:$0xff] }
  0x10   : > { %v213_v9 = vld [vmem:[%s198_s27 + $0x18] sm:$0xff]  ;;  %v214_v10 = vadd.f32 %v212_v8, %v210_v6 }
  0x11   : > { %v221_v11 = vadd.f32 %v213_v9, %v211_v7 }
  0x12   : > { %v215_v12 = vrot.slane %v214_v10, 4 }
  0x13   : > { %v222_v13 = vrot.slane %v221_v11, 4  ;;  %v452_v14 = vpop.eup %451 }
  0x14   : > { %v216_v15 = vadd.f32 %v215_v12, %v214_v10  ;;  %v229_v17 = vmul.f32 16.0, %v452_v14  ;;  %vm233_vm0 = vweird.f32 %v452_v14 }
  0x15   : > { %v223_v16 = vadd.f32 %v222_v13, %v221_v11 }
  0x16   : > { %312 = vperm.xlu1 %450, %v304_v3   ;;  %296 = vperm.xlu0 %449, %v288_v4   ;;  %v217_v18 = vrot.slane %v216_v15, 2  ;;  %v230_v20 = vsub.f32 1.0, %v229_v17 }
  0x17   : > { %v224_v19 = vrot.slane %v223_v16, 2 }
  0x18   : > { %v218_v21 = vadd.f32 %v217_v18, %v216_v15  ;;  %v231_v23 = vmul.f32 %v452_v14, %v230_v20 }
  0x19   : > { %v225_v22 = vadd.f32 %v224_v19, %v223_v16 }
  0x1a   : > { %v219_v24 = vrot.slane %v218_v21, 1  ;;  %v232_v26 = vadd.f32 %v452_v14, %v231_v23 }
  0x1b   : > { %v226_v25 = vrot.slane %v225_v22, 1 }
  0x1c   : > { %v220_v27 = vadd.f32 %v219_v24, %v218_v21  ;;  %v234_v29 = vsel %vm233_vm0, %v452_v14, %v232_v26 }
  0x1d   : > { %v227_v28 = vadd.f32 %v226_v25, %v225_v22 }
  0x1e   : > { %v235_v30 = vmul.f32 %v234_v29, %v220_v27 }
  0x1f   : > { %v236_v31 = vmul.f32 %v234_v29, %v227_v28 }
  0x20   : > { %v237_v32 = vsub.f32 %v210_v6, %v235_v30  ;;  %v239_v33 = vsub.f32 %v212_v8, %v235_v30 }
  0x21   : > { %v238_v34 = vsub.f32 %v211_v7, %v236_v31  ;;  %v240_v35 = vsub.f32 %v213_v9, %v236_v31 }
  0x22   : > { %v241_v36 = vmul.f32 %v237_v32, %v237_v32  ;;  %v243_v37 = vmul.f32 %v239_v33, %v239_v33 }
  0x23   : > { %v242_v38 = vmul.f32 %v238_v34, %v238_v34  ;;  %v244_v39 = vmul.f32 %v240_v35, %v240_v35 }
  0x24   : > { %v245_v40 = vadd.f32 %v243_v37, %v241_v36 }
  0x25   : > { %v252_v41 = vadd.f32 %v244_v39, %v242_v38 }
  0x26   : > { %v246_v42 = vrot.slane %v245_v40, 4 }
  0x27   : > { %v253_v43 = vrot.slane %v252_v41, 4 }
  0x28   : > { %v247_v44 = vadd.f32 %v246_v42, %v245_v40 }
  0x29   : > { %v254_v45 = vadd.f32 %v253_v43, %v252_v41 }
  0x2a   : > { %v248_v46 = vrot.slane %v247_v44, 2 }
  0x2b   : > { %v255_v47 = vrot.slane %v254_v45, 2 }
  0x2c   : > { %v249_v48 = vadd.f32 %v248_v46, %v247_v44 }
  0x2d   : > { %v256_v49 = vadd.f32 %v255_v47, %v254_v45 }
  0x2e   : > { %v250_v50 = vrot.slane %v249_v48, 1 }
  0x2f   : > { %v257_v51 = vrot.slane %v256_v49, 1 }
  0x30   : > { %v251_v52 = vadd.f32 %v250_v50, %v249_v48 }
  0x31   : > { %v258_v53 = vadd.f32 %v257_v51, %v256_v49 }
  0x32   : > { %v259_v54 = vmul.f32 %v251_v52, %v234_v29 }
  0x33   : > { %v260_v55 = vmul.f32 %v258_v53, %v234_v29 }
  0x34   : > { %v261_v56 = vadd.f32 1e-06, %v259_v54 }
  0x35   : > { %v262_v57 = vadd.f32 1e-06, %v260_v55 }
  0x36   : > { %453 = vrsqrt.f32 %v261_v56  ;;  %vm269_vm1 = vweird.f32 %v261_v56 }
  0x37   : > { %455 = vrsqrt.f32 %v262_v57  ;;  %vm279_vm3 = vweird.f32 %v262_v57 }
  0x3c   : > { %v454_v58 = vpop.eup %453 }
  0x3d   : > { %v456_v59 = vpop.eup %455  ;;  %v264_v60 = vmul.f32 %v454_v58, %v261_v56  ;;  %vm270_vm2 = vweird.f32 %v454_v58 }
  0x3e   : > { %v274_v61 = vmul.f32 %v456_v59, %v262_v57  ;;  %vm280_vm4 = vweird.f32 %v456_v59  ;;  %vm271_vm5 = vmor %vm269_vm1, %vm270_vm2 }
  0x3f   : > { %v265_v62 = vmul.f32 %v454_v58, %v264_v60  ;;  %vm281_vm6 = vmor %vm279_vm3, %vm280_vm4 }
  0x40   : > { %v275_v63 = vmul.f32 %v456_v59, %v274_v61 }
  0x41   : > { %v266_v0 = vmul.f32 0.5, %v265_v62 }
  0x42   : > { %v276_v1 = vmul.f32 0.5, %v275_v63 }
  0x43   : > { %v267_v2 = vsub.f32 1.5, %v266_v0 }
  0x44   : > { %v277_v3 = vsub.f32 1.5, %v276_v1 }
  0x45   : > { %v268_v4 = vmul.f32 %v454_v58, %v267_v2 }
  0x46   : > { %v278_v5 = vmul.f32 %v456_v59, %v277_v3 }
  0x47   : > { %v272_v6 = vsel %vm271_vm5, %v454_v58, %v268_v4 }
  0x48   : > { %v282_v7 = vsel %vm281_vm6, %v456_v59, %v278_v5  ;;  %v283_v8 = vmul.f32 %v272_v6, %v237_v32  ;;  %v285_v16 = vmul.f32 %v272_v6, %v239_v33 }
  0x49   : > { %v284_v9 = vmul.f32 %v282_v7, %v238_v34  ;;  %v286_v17 = vmul.f32 %v282_v7, %v240_v35 }
  0x80   : > { %v308_v10 = vpop.permute.xlu1 %307  ;;  %v292_v11 = vpop.permute.xlu0 %291 }
  0x81   : > { %v299_v12 = vmul.f32 %v292_v11, %v283_v8  ;;  %v300_v13 = vmul.f32 %v292_v11, %v284_v9 }
  0x83   : > { %v315_v14 = vadd.f32 %v308_v10, %v299_v12  ;;  %v316_v15 = vadd.f32 %v308_v10, %v300_v13 }
  0x85   : > { %319 = vst [vmem:[%s208_s30] sm:$0xff] %v315_v14 }
  0x86   : > { %320 = vst [vmem:[%s208_s30 + $0x8] sm:$0xff] %v316_v15 }
  0x88   : > { %v297_v18 = vpop.permute.xlu0 %296  ;;  %v313_v21 = vpop.permute.xlu1 %312 }
  0x89   : > { %v301_v19 = vmul.f32 %v297_v18, %v285_v16  ;;  %v302_v20 = vmul.f32 %v297_v18, %v286_v17 }
  0x8b   : > { %v317_v22 = vadd.f32 %v313_v21, %v301_v19  ;;  %v318_v23 = vadd.f32 %v313_v21, %v302_v20 }
  0x8d   : > { %321 = vst [vmem:[%s208_s30 + $0x10] sm:$0xff] %v317_v22 }
  0x8e   : > { %322 = vst [vmem:[%s208_s30 + $0x18] sm:$0xff] %v318_v23 }
  0x8f PF: > { %s13_s14 = sadd.s32 1, %s479_s14   ;;  %s559_s12 = smov %s475_s13 }
  0x90   : > { %p10_p5 = scmp.ge.s32.totalorder %s13_s14, 4   ;;  %s560_s13 = smov %s562_s15 }
  0x92   :  { %12 = sbr.rel (!%p10_p5) target bundleno = 2 (0x2), region = 62 }

</bundles_post_ra>
